<compile_context>
chip_gen: v6e
topology: v6e:2x2x1
jax: 0.10.0
libtpu: 0.0.40
codegen_flags: <defaults>
</compile_context>

<pallas_src>
import functools

import jax
import jax.numpy as jnp
from jax.experimental import pallas as pl
from jax.experimental.pallas import tpu as pltpu

_LANE = 128


def _round_up(x, m):
    return ((x + m - 1) // m) * m


def _fused_kernel(x_ref, w1_ref, vecs_ref, w2_ref, b2_ref, o_ref, acc_ref,
                  *, inv_hw, chunk, last_valid, needs_mask):
    """Grid axis 0 walks HW chunks (reduction); head runs on the last step only."""
    k = pl.program_id(0)
    last = pl.num_programs(0) - 1

    # ---- init pooled-sum accumulator on the first HW chunk ----
    @pl.when(k == 0)
    def _():
        acc_ref[...] = jnp.zeros_like(acc_ref)

    # ---- partial sum over this HW chunk (f32 accumulation; mem-bound path) ----
    if needs_mask:
        # Ragged last chunk: the OOB tail of the boundary block holds undefined data,
        # mask it out.  Only the final grid step pays the select.
        @pl.when(k < last)
        def _():
            acc_ref[...] += jnp.sum(x_ref[...].astype(jnp.float32), axis=1)

        @pl.when(k == last)
        def _():
            iota = jax.lax.broadcasted_iota(jnp.int32, (1, chunk, 1), 1)
            xs = jnp.where(iota < last_valid, x_ref[...].astype(jnp.float32), 0.0)
            acc_ref[...] += jnp.sum(xs, axis=1)
    else:
        acc_ref[...] += jnp.sum(x_ref[...].astype(jnp.float32), axis=1)

    # ---- finalize: pooled mean -> Linear -> BatchNorm1d (batch stats) -> LeakyReLU -> Linear ----
    @pl.when(k == last)
    def _():
        pooled = acc_ref[...] * inv_hw                                   # [B, C] f32

        h = jnp.dot(pooled.astype(w1_ref.dtype), w1_ref[...],
                    preferred_element_type=jnp.float32)                  # [B, INJp]
        h = h + vecs_ref[0:1, :]                                         # + b1

        # BatchNorm1d, training-mode normalization: biased batch mean/var over batch dim.
        mean = jnp.mean(h, axis=0, keepdims=True)
        diff = h - mean
        var = jnp.mean(diff * diff, axis=0, keepdims=True)
        hn = diff * jax.lax.rsqrt(var + 1e-5)
        hn = hn * vecs_ref[1:2, :] + vecs_ref[2:3, :]                    # * gamma + beta

        # LeakyReLU(0.2)
        a = jnp.where(hn > 0, hn, 0.2 * hn)

        o = jnp.dot(a.astype(w2_ref.dtype), w2_ref[...],
                    preferred_element_type=jnp.float32)                  # [B, Lp]
        o_ref[...] = (o + b2_ref[...]).astype(o_ref.dtype)


def resnet_head_forward(feat_nhwc, w1, b1, gamma, beta, w2, b2,
                        *, matmul_dtype=jnp.float32, max_hw_chunk=None):
    """Fused global-avg-pool + Linear + BatchNorm1d + LeakyReLU(0.2) + Linear.

    feat_nhwc: [B, H, W, C] channels-last final feature map (f32 or bf16; bf16 halves the
               dominant HBM read, pooling still accumulates in f32).
    w1 [C, INJ], b1 [INJ], gamma/beta [INJ], w2 [INJ, L], b2 [L]  (weights stored [in, out],
    equivalent to PyTorch's x @ W.T + b with W [out, in]).
    matmul_dtype=bf16 is only worth it for large B / INJ; the default keeps f32 (no casts).
    """
    B, H, W, C = feat_nhwc.shape
    HW = H * W
    Cin, INJ = w1.shape
    L = w2.shape[1]
    assert Cin == C

    # --- lane-dense padding of the head widths (unmasked vector stores) ---
    inj_p = _round_up(INJ, _LANE)
    l_p = _round_up(L, _LANE)
    f32 = jnp.float32
    wdt = jnp.dtype(matmul_dtype)
    wbytes = wdt.itemsize

    # Big matmul operands pre-cast to the matmul dtype (halves DMA/VMEM when bf16).
    w1p = jnp.zeros((C, inj_p), wdt).at[:, :INJ].set(w1.astype(wdt))
    w2p = jnp.zeros((inj_p, l_p), wdt).at[:INJ, :L].set(w2.astype(wdt))
    # b1 / gamma / beta packed into one block (one DMA descriptor, one sublane-padded tile).
    vecs = jnp.zeros((3, inj_p), f32)
    vecs = vecs.at[0, :INJ].set(b1.astype(f32))
    vecs = vecs.at[1, :INJ].set(gamma.astype(f32))
    vecs = vecs.at[2, :INJ].set(beta.astype(f32))
    b2p = jnp.zeros((1, l_p), f32).at[0, :L].set(b2.astype(f32))

    # --- feature map: flat HW axis, NO padding and NO dtype cast (free metadata reshape) ---
    x = feat_nhwc.reshape(B, HW, C)
    in_itemsize = jnp.dtype(x.dtype).itemsize
    sub = {4: 8, 2: 16, 1: 32}.get(in_itemsize, 8)        # sublane multiple per dtype

    # --- per-generation VMEM budget (v5e/v6e 128 MiB, v7x 64 MiB physical) ---
    try:
        vmem_cap = int(pltpu.get_tpu_info().vmem_capacity_bytes)
    except Exception:
        vmem_cap = 64 * 1024 * 1024                        # conservative (v7x) fallback
    budget = (vmem_cap * 3) // 4                           # ≈48 MiB v7x, ≈96 MiB v5e/v6e

    # Static VMEM accounting (weights & output are 2-deep pipelined by default).
    resident = 2 * (C * inj_p + inj_p * l_p) * wbytes      # w1p + w2p
    resident += 2 * (8 * inj_p + 8 * l_p) * 4              # vecs + b2 (sublane-padded tiles)
    resident += B * C * 4                                  # pooled-sum accumulator scratch
    resident += 2 * B * l_p * 4                            # output block
    slab_budget = budget - resident - (2 << 20)            # small margin

    # Largest double-buffered HW slab that fits; full-HW single block if it all fits.
    chunk = slab_budget // (2 * B * C * in_itemsize)
    if max_hw_chunk is not None:
        chunk = min(chunk, max_hw_chunk)
    chunk = (chunk // sub) * sub
    chunk = max(sub, chunk)          # TODO(synk): tile B as well if even one sublane-row slab
    if chunk >= HW:                  #             per step exceeds the budget (huge B*C).
        chunk = HW                   # one full-HW block: single step, no ragged masking
    n_steps = pl.cdiv(HW, chunk)
    needs_mask = (HW % chunk) != 0
    last_valid = HW - (n_steps - 1) * chunk
    inv_hw = 1.0 / float(HW)

    kernel = functools.partial(_fused_kernel, inv_hw=inv_hw, chunk=chunk,
                               last_valid=last_valid, needs_mask=needs_mask)

    cost = pl.CostEstimate(
        flops=int(B * HW * C + 2 * B * C * inj_p + 2 * B * inj_p * l_p + 10 * B * inj_p),
        transcendentals=int(inj_p),
        bytes_accessed=int(B * HW * C * in_itemsize
                           + (C * inj_p + inj_p * l_p) * wbytes
                           + (3 * inj_p + l_p) * 4
                           + B * l_p * 4),
    )

    out_padded = pl.pallas_call(
        kernel,
        out_shape=jax.ShapeDtypeStruct((B, l_p), jnp.float32),
        grid=(n_steps,),
        in_specs=[
            pl.BlockSpec((B, chunk, C), lambda k: (0, k, 0)),   # feature-map HW slab
            pl.BlockSpec((C, inj_p), lambda k: (0, 0)),         # w1 (resident across steps)
            pl.BlockSpec((3, inj_p), lambda k: (0, 0)),         # [b1; gamma; beta]
            pl.BlockSpec((inj_p, l_p), lambda k: (0, 0)),       # w2
            pl.BlockSpec((1, l_p), lambda k: (0, 0)),           # b2
        ],
        out_specs=pl.BlockSpec((B, l_p), lambda k: (0, 0)),
        scratch_shapes=[pltpu.VMEM((B, C), jnp.float32)],       # pooled-sum accumulator
        compiler_params=pltpu.CompilerParams(
            # single grid axis is the HW reduction -> "arbitrary" (output revisited / accumulator)
            dimension_semantics=("arbitrary",),
            vmem_limit_bytes=int(budget),
        ),
        cost_estimate=cost,
    )(x, w1p, vecs, w2p, b2p)

    return out_padded[:, :L]


# ----------------------------------------------------------------------------
# Pure-JAX reference for verification
# ----------------------------------------------------------------------------
def reference_forward(feat_nhwc, w1, b1, gamma, beta, w2, b2):
    pooled = jnp.mean(feat_nhwc.astype(jnp.float32), axis=(1, 2))    # [B, C]
    h = pooled @ w1 + b1
    mean = jnp.mean(h, axis=0, keepdims=True)
    var = jnp.mean((h - mean) ** 2, axis=0, keepdims=True)
    hn = (h - mean) / jnp.sqrt(var + 1e-5) * gamma + beta
    a = jnp.where(hn > 0, hn, 0.2 * hn)
    return a @ w2 + b2


if __name__ == "__main__":
    # Small, deterministic synthetic configuration:
    #   hidden_sizes[-1] = 32, linear_injection = -1  => inj = 32, label_size = 8
    B, H, W, C = 2, 8, 8, 32
    INJ, L = 32, 8

    key = jax.random.PRNGKey(0)
    k_feat, k_w1, k_w2, k_b1, k_b2 = jax.random.split(key, 5)

    # Synthetic "last feature map" of the ResNet backbone (channels-last layout).
    feat = jax.random.normal(k_feat, (B, H, W, C), dtype=jnp.float32)

    # Deterministic parameter init (stored as [in, out]).
    w1 = 0.02 * jax.random.normal(k_w1, (C, INJ), dtype=jnp.float32)
    b1 = 0.01 * jax.random.normal(k_b1, (INJ,), dtype=jnp.float32)
    gamma = jnp.ones((INJ,), dtype=jnp.float32)
    beta = jnp.zeros((INJ,), dtype=jnp.float32)
    w2 = 0.02 * jax.random.normal(k_w2, (INJ, L), dtype=jnp.float32)
    b2 = 0.01 * jax.random.normal(k_b2, (L,), dtype=jnp.float32)

    ref = reference_forward(feat, w1, b1, gamma, beta, w2, b2)

    # 1) Default path: budget picks one full-HW block (single grid step).
    logits = resnet_head_forward(feat, w1, b1, gamma, beta, w2, b2)
    logits = jax.block_until_ready(logits)
    assert logits.shape == (B, L)
    assert jnp.allclose(logits, ref, atol=1e-4, rtol=1e-4), "full-HW path mismatch"

    # 2) Chunked path with a ragged last chunk (HW=64, chunk=24 -> 3 steps, last has 16 rows)
    #    exercises init / accumulate / in-kernel mask / finalize.
    logits_c = resnet_head_forward(feat, w1, b1, gamma, beta, w2, b2, max_hw_chunk=24)
    logits_c = jax.block_until_ready(logits_c)
    assert jnp.allclose(logits_c, ref, atol=1e-4, rtol=1e-4), "chunked path mismatch"

    # 3) bf16 feature-map path (halves the dominant HBM read; f32 accumulation in-kernel).
    logits_bf16 = resnet_head_forward(feat.astype(jnp.bfloat16),
                                      w1, b1, gamma, beta, w2, b2)
    logits_bf16 = jax.block_until_ready(logits_bf16)
    assert logits_bf16.shape == (B, L)
    assert bool(jnp.isfinite(logits_bf16).all()), "bf16 path produced non-finite values"

    print("KERNEL_OK")
</pallas_src>

<mosaic_0001>
module attributes {stable_mosaic.version = 11 : i64} {
  func.func @_fused_kernel(%arg0: i32, %arg1: memref<2x64x32xf32, #tpu.memory_space<vmem>>, %arg2: memref<32x128xf32, #tpu.memory_space<vmem>>, %arg3: memref<3x128xf32, #tpu.memory_space<vmem>>, %arg4: memref<128x128xf32, #tpu.memory_space<vmem>>, %arg5: memref<1x128xf32, #tpu.memory_space<vmem>>, %arg6: memref<2x128xf32, #tpu.memory_space<vmem>>, %arg7: memref<2x32xf32, #tpu.memory_space<vmem>>) attributes {dimension_semantics = [#tpu.dimension_semantics<arbitrary>], iteration_bounds = array<i64: 1>, scalar_prefetch = 0 : i64, scratch_operands = 1 : i64, tpu.core_type = #tpu.core_type<tc>, window_params = [{transform_indices = @transform_0, window_bounds = array<i64: 2, 64, 32>}, {pipeline_mode = #tpu.pipeline_mode<synchronous>, transform_indices = @transform_1, window_bounds = array<i64: 32, 128>}, {pipeline_mode = #tpu.pipeline_mode<synchronous>, transform_indices = @transform_2, window_bounds = array<i64: 3, 128>}, {pipeline_mode = #tpu.pipeline_mode<synchronous>, transform_indices = @transform_3, window_bounds = array<i64: 128, 128>}, {pipeline_mode = #tpu.pipeline_mode<synchronous>, transform_indices = @transform_4, window_bounds = array<i64: 1, 128>}, {pipeline_mode = #tpu.pipeline_mode<synchronous>, transform_indices = @transform_5, window_bounds = array<i64: 2, 128>}]} {
    %c0_i32 = arith.constant 0 : i32
    %0 = arith.cmpi eq, %arg0, %c0_i32 : i32
    %1 = arith.extui %0 : i1 to i32
    %c0_i32_0 = arith.constant 0 : i32
    %2 = arith.cmpi ne, %1, %c0_i32_0 : i32
    scf.if %2 {
      %cst_9 = arith.constant 0.000000e+00 : f32
      %11 = vector.broadcast %cst_9 : f32 to vector<2x32xf32>
      %c0_10 = arith.constant 0 : index
      %c0_11 = arith.constant 0 : index
      %12 = vector.load %arg7[%c0_10, %c0_11] : memref<2x32xf32, #tpu.memory_space<vmem>>, vector<2x32xf32>
      tpu.vector_store %arg7[%c0_10, %c0_11], %11 {strides = array<i32>} : memref<2x32xf32, #tpu.memory_space<vmem>>, vector<2x32xf32>,
    } else {
    }
    %c0 = arith.constant 0 : index
    %c0_1 = arith.constant 0 : index
    %3 = vector.load %arg7[%c0, %c0_1] : memref<2x32xf32, #tpu.memory_space<vmem>>, vector<2x32xf32>
    %c0_2 = arith.constant 0 : index
    %c0_3 = arith.constant 0 : index
    %c0_4 = arith.constant 0 : index
    %4 = vector.load %arg1[%c0_2, %c0_3, %c0_4] : memref<2x64x32xf32, #tpu.memory_space<vmem>>, vector<2x64x32xf32>
    %cst = arith.constant dense<0.000000e+00> : vector<2x32xf32>
    %5 = vector.multi_reduction <add>, %4, %cst [1] : vector<2x64x32xf32> to vector<2x32xf32>
    %6 = arith.addf %3, %5 : vector<2x32xf32>
    %c0_5 = arith.constant 0 : index
    %c0_6 = arith.constant 0 : index
    %7 = vector.load %arg7[%c0_5, %c0_6] : memref<2x32xf32, #tpu.memory_space<vmem>>, vector<2x32xf32>
    tpu.vector_store %arg7[%c0_5, %c0_6], %6 {strides = array<i32>} : memref<2x32xf32, #tpu.memory_space<vmem>>, vector<2x32xf32>,
    %c0_i32_7 = arith.constant 0 : i32
    %8 = arith.cmpi eq, %arg0, %c0_i32_7 : i32
    %9 = arith.extui %8 : i1 to i32
    %c0_i32_8 = arith.constant 0 : i32
    %10 = arith.cmpi ne, %9, %c0_i32_8 : i32
    scf.if %10 {
      %c0_9 = arith.constant 0 : index
      %c0_10 = arith.constant 0 : index
      %11 = vector.load %arg7[%c0_9, %c0_10] : memref<2x32xf32, #tpu.memory_space<vmem>>, vector<2x32xf32>
      %cst_11 = arith.constant 1.562500e-02 : f32
      %12 = vector.broadcast %cst_11 : f32 to vector<2x32xf32>
      %13 = arith.mulf %11, %12 : vector<2x32xf32>
      %c0_12 = arith.constant 0 : index
      %c0_13 = arith.constant 0 : index
      %14 = vector.load %arg2[%c0_12, %c0_13] : memref<32x128xf32, #tpu.memory_space<vmem>>, vector<32x128xf32>
      %cst_14 = arith.constant dense<0.000000e+00> : vector<2x128xf32>
      %15 = tpu.matmul %13, %14, %cst_14 {dimension_numbers = #tpu.dot_dimension_numbers<[1], [0], [0], [1], [0, 0, 1, 1], [], []>} : vector<2x32xf32>, vector<32x128xf32>, vector<2x128xf32> -> vector<2x128xf32>
      %c0_15 = arith.constant 0 : index
      %c0_16 = arith.constant 0 : index
      %16 = vector.load %arg3[%c0_15, %c0_16] : memref<3x128xf32, #tpu.memory_space<vmem>>, vector<1x128xf32>
      %17 = vector.broadcast %16 : vector<1x128xf32> to vector<2x128xf32>
      %18 = arith.addf %15, %17 : vector<2x128xf32>
      %cst_17 = arith.constant dense<0.000000e+00> : vector<128xf32>
      %19 = vector.multi_reduction <add>, %18, %cst_17 [0] : vector<2x128xf32> to vector<128xf32>
      %20 = vector.shape_cast %19 : vector<128xf32> to vector<1x128xf32>
      %cst_18 = arith.constant 2.000000e+00 : f32
      %21 = vector.broadcast %cst_18 : f32 to vector<1x128xf32>
      %22 = arith.divf %20, %21 : vector<1x128xf32>
      %23 = vector.broadcast %22 : vector<1x128xf32> to vector<2x128xf32>
      %24 = arith.subf %18, %23 : vector<2x128xf32>
      %25 = arith.mulf %24, %24 : vector<2x128xf32>
      %cst_19 = arith.constant dense<0.000000e+00> : vector<128xf32>
      %26 = vector.multi_reduction <add>, %25, %cst_19 [0] : vector<2x128xf32> to vector<128xf32>
      %27 = vector.shape_cast %26 : vector<128xf32> to vector<1x128xf32>
      %cst_20 = arith.constant 2.000000e+00 : f32
      %28 = vector.broadcast %cst_20 : f32 to vector<1x128xf32>
      %29 = arith.divf %27, %28 : vector<1x128xf32>
      %cst_21 = arith.constant 9.99999974E-6 : f32
      %30 = vector.broadcast %cst_21 : f32 to vector<1x128xf32>
      %31 = arith.addf %29, %30 : vector<1x128xf32>
      %32 = math.rsqrt %31 : vector<1x128xf32>
      %33 = vector.broadcast %32 : vector<1x128xf32> to vector<2x128xf32>
      %34 = arith.mulf %24, %33 : vector<2x128xf32>
      %c1 = arith.constant 1 : index
      %c0_22 = arith.constant 0 : index
      %35 = vector.load %arg3[%c1, %c0_22] : memref<3x128xf32, #tpu.memory_space<vmem>>, vector<1x128xf32>
      %36 = vector.broadcast %35 : vector<1x128xf32> to vector<2x128xf32>
      %37 = arith.mulf %34, %36 : vector<2x128xf32>
      %c2 = arith.constant 2 : index
      %c0_23 = arith.constant 0 : index
      %38 = vector.load %arg3[%c2, %c0_23] : memref<3x128xf32, #tpu.memory_space<vmem>>, vector<1x128xf32>
      %39 = vector.broadcast %38 : vector<1x128xf32> to vector<2x128xf32>
      %40 = arith.addf %37, %39 : vector<2x128xf32>
      %cst_24 = arith.constant 0.000000e+00 : f32
      %41 = vector.broadcast %cst_24 : f32 to vector<2x128xf32>
      %42 = arith.cmpf ogt, %40, %41 : vector<2x128xf32>
      %cst_25 = arith.constant 2.000000e-01 : f32
      %43 = vector.broadcast %cst_25 : f32 to vector<2x128xf32>
      %44 = arith.mulf %43, %40 : vector<2x128xf32>
      %45 = arith.select %42, %40, %44 : vector<2x128xi1>, vector<2x128xf32>
      %c0_26 = arith.constant 0 : index
      %c0_27 = arith.constant 0 : index
      %46 = vector.load %arg4[%c0_26, %c0_27] : memref<128x128xf32, #tpu.memory_space<vmem>>, vector<128x128xf32>
      %cst_28 = arith.constant dense<0.000000e+00> : vector<2x128xf32>
      %47 = tpu.matmul %45, %46, %cst_28 {dimension_numbers = #tpu.dot_dimension_numbers<[1], [0], [0], [1], [0, 0, 1, 1], [], []>} : vector<2x128xf32>, vector<128x128xf32>, vector<2x128xf32> -> vector<2x128xf32>
      %c0_29 = arith.constant 0 : index
      %c0_30 = arith.constant 0 : index
      %48 = vector.load %arg5[%c0_29, %c0_30] : memref<1x128xf32, #tpu.memory_space<vmem>>, vector<1x128xf32>
      %49 = vector.broadcast %48 : vector<1x128xf32> to vector<2x128xf32>
      %50 = arith.addf %47, %49 : vector<2x128xf32>
      %c0_31 = arith.constant 0 : index
      %c0_32 = arith.constant 0 : index
      %51 = vector.load %arg6[%c0_31, %c0_32] : memref<2x128xf32, #tpu.memory_space<vmem>>, vector<2x128xf32>
      tpu.vector_store %arg6[%c0_31, %c0_32], %50 {strides = array<i32>} : memref<2x128xf32, #tpu.memory_space<vmem>>, vector<2x128xf32>,
    } else {
    }
    return
  }
  func.func @transform_0(%arg0: i32) -> (i32, i32, i32) {
    %c0_i32 = arith.constant 0 : i32
    %c0_i32_0 = arith.constant 0 : i32
    %c0_i32_1 = arith.constant 0 : i32
    return %c0_i32, %arg0, %c0_i32_0 : i32, i32, i32
  }
  func.func @transform_1(%arg0: i32) -> (i32, i32) {
    %c0_i32 = arith.constant 0 : i32
    %c0_i32_0 = arith.constant 0 : i32
    %c0_i32_1 = arith.constant 0 : i32
    return %c0_i32, %c0_i32_0 : i32, i32
  }
  func.func @transform_2(%arg0: i32) -> (i32, i32) {
    %c0_i32 = arith.constant 0 : i32
    %c0_i32_0 = arith.constant 0 : i32
    %c0_i32_1 = arith.constant 0 : i32
    return %c0_i32, %c0_i32_0 : i32, i32
  }
  func.func @transform_3(%arg0: i32) -> (i32, i32) {
    %c0_i32 = arith.constant 0 : i32
    %c0_i32_0 = arith.constant 0 : i32
    %c0_i32_1 = arith.constant 0 : i32
    return %c0_i32, %c0_i32_0 : i32, i32
  }
  func.func @transform_4(%arg0: i32) -> (i32, i32) {
    %c0_i32 = arith.constant 0 : i32
    %c0_i32_0 = arith.constant 0 : i32
    %c0_i32_1 = arith.constant 0 : i32
    return %c0_i32, %c0_i32_0 : i32, i32
  }
  func.func @transform_5(%arg0: i32) -> (i32, i32) {
    %c0_i32 = arith.constant 0 : i32
    %c0_i32_0 = arith.constant 0 : i32
    %c0_i32_1 = arith.constant 0 : i32
    return %c0_i32, %c0_i32_0 : i32, i32
  }
}

</mosaic_0001>

<bundles_post_ra>
// kernel: tpu_custom_call.1
= control target key start
LH: loop header
LB: loop body
LE: loop exit
PB: predicated region body
PF: predicated region fallthrough
CT: control target
= control target key end

     0   :  { %vm25_vm0 = vcmask 254976   ;;  %v428_v1 = vmov 0.0   ;;  %vm429_vm1 = vmmov 0   ;;  %vm44_vm2 = vcmask 261120   ;;  %s628_s0 = inlined_call_operand.vmem [shape: f32[2,64,32], index: 0, kind: input, shape index: {}]   ;;  %s629_s1 = inlined_call_operand.vmem [shape: f32[32,128], index: 1, kind: input, shape index: {}]   ;;  %s630_s2 = inlined_call_operand.vmem [shape: f32[3,128], index: 2, kind: input, shape index: {}]   ;;  %s631_s3 = inlined_call_operand.vmem [shape: f32[128,128], index: 3, kind: input, shape index: {}]   ;;  %s632_s4 = inlined_call_operand.vmem [shape: f32[1,128], index: 4, kind: input, shape index: {}]   ;;  %s633_s5 = inlined_call_operand.hbm [shape: f32[2,128], index: 5, kind: output, shape index: {}]  }
   0x1   :  { %v103_v0 = vld [vmem:[%s629_s1 + $0x18] sm:$0xff]  ;;  %355 = vmatprep.subr.mxu0 %v428_v1  ;;  %v102_v2 = vld [vmem:[%s629_s1 + $0x10] sm:$0xff]  ;;  %363 = vmatprep.mubr.msk.f32.mxu0 %vm429_vm1, %v428_v1  ;;  %26 = vst.msk [vmem:[#allocation2] sm:$0x3] %vm25_vm0, %v428_v1  ;;  %v28_v3 = vld [vmem:[%s628_s0] sm:$0xff] }
   0x2   :  { %v29_v4 = vld [vmem:[%s628_s0 + $0x8] sm:$0xff]  ;;  %356 = vmatpush3.msra.mxu0 %v103_v0  ;;  %v30_v5 = vld [vmem:[%s628_s0 + $0x10] sm:$0xff]  ;;  %v31_v6 = vld [vmem:[%s628_s0 + $0x18] sm:$0xff]  ;;  %v45_v7 = vsel %vm44_vm2, %v28_v3, 0.0  ;;  %366 = vmatprep.subr.mxu1 %v428_v1 }
   0x3   :  { %v46_v8 = vsel %vm44_vm2, %v29_v4, 0.0  ;;  %357 = vmatprep.subr.mxu0 %v428_v1  ;;  %v101_v9 = vld [vmem:[%s629_s1 + $0x8] sm:$0xff]  ;;  %v32_v10 = vld [vmem:[%s628_s0 + $0x20] sm:$0xff]  ;;  %v48_v12 = vsel %vm44_vm2, %v30_v5, 0.0  ;;  %398 = vmatprep.mubr.msk.f32.mxu1 %vm429_vm1, %v428_v1  ;;  %v38_v15 = vld [vmem:[%s628_s0 + $0x50] sm:$0xff]  ;;  %v50_v16 = vsel %vm44_vm2, %v31_v6, 0.0 }
   0x4   :  { %v47_v11 = vadd.f32 %v46_v8, %v45_v7  ;;  %358 = vmatpush3.msra.mxu0 %v102_v2  ;;  %v36_v13 = vld [vmem:[%s628_s0 + $0x40] sm:$0xff]  ;;  %v37_v14 = vld [vmem:[%s628_s0 + $0x48] sm:$0xff]  ;;  %v39_v19 = vld [vmem:[%s628_s0 + $0x58] sm:$0xff]  ;;  %v69_v23 = vsel %vm44_vm2, %v38_v15, 0.0  ;;  %v52_v25 = vsel %vm44_vm2, %v32_v10, 0.0 }
   0x5   :  { %359 = vmatprep.subr.mxu0 %v428_v1  ;;  %v100_v17 = vld [vmem:[%s629_s1] sm:$0xff]  ;;  %v33_v18 = vld [vmem:[%s628_s0 + $0x28] sm:$0xff]  ;;  %v66_v21 = vsel %vm44_vm2, %v36_v13, 0.0  ;;  %v67_v22 = vsel %vm44_vm2, %v37_v14, 0.0  ;;  %v34_v27 = vld [vmem:[%s628_s0 + $0x30] sm:$0xff]  ;;  %v71_v29 = vsel %vm44_vm2, %v39_v19, 0.0 }
   0x6   :  { %v49_v20 = vadd.f32 %v48_v12, %v47_v11  ;;  %360 = vmatpush3.msra.mxu0 %v101_v9  ;;  %v40_v24 = vld [vmem:[%s628_s0 + $0x60] sm:$0xff]  ;;  %v68_v26 = vadd.f32 %v67_v22, %v66_v21 }
   0x7   :  { %361 = vmatprep.subr.mxu0 %v428_v1 }
   0x8   :  { %v51_v28 = vadd.f32 %v50_v16, %v49_v20 }
   0x9   :  { %10 = vsyncpa [#allocation4], 0  ;;  %362 = vmatpush3.msra.mxu0 %v100_v17  ;;  %v41_v30 = vld [vmem:[%s628_s0 + $0x68] sm:$0xff]  ;;  %v54_v31 = vsel %vm44_vm2, %v33_v18, 0.0  ;;  %v70_v32 = vadd.f32 %v69_v23, %v68_v26  ;;  %v35_v33 = vld [vmem:[%s628_s0 + $0x38] sm:$0xff]  ;;  %v73_v35 = vsel %vm44_vm2, %v40_v24, 0.0 }
   0xa   :  { %v53_v34 = vadd.f32 %v52_v25, %v51_v28  ;;  %v42_v36 = vld [vmem:[%s628_s0 + $0x70] sm:$0xff]  ;;  %v56_v37 = vsel %vm44_vm2, %v34_v27, 0.0  ;;  %v75_v40 = vsel %vm44_vm2, %v41_v30, 0.0  ;;  %v43_v41 = vld [vmem:[%s628_s0 + $0x78] sm:$0xff]  ;;  %v58_v42 = vsel %vm44_vm2, %v35_v33, 0.0  ;;  %v233_v7 = vld [vmem:[%s631_s3 + $0x68] sm:$0xff] }
   0xb   :  { %v72_v38 = vadd.f32 %v71_v29, %v70_v32  ;;  %v77_v45 = vsel %vm44_vm2, %v42_v36, 0.0  ;;  %v79_v48 = vsel %vm44_vm2, %v43_v41, 0.0  ;;  %vm89_vm3 = vcmask 1041409   ;;  %v27_v62 = vld [vmem:[#allocation2] sm:$0x3]  ;;  %v235_v5 = vld [vmem:[%s631_s3 + $0x78] sm:$0xff] }
   0xc   :  { %v55_v39 = vadd.f32 %v54_v31, %v53_v34  ;;  %367 = vmatpush3.msra.mxu1 %v235_v5  ;;  %v234_v6 = vld [vmem:[%s631_s3 + $0x70] sm:$0xff]  ;;  %v232_v8 = vld [vmem:[%s631_s3 + $0x60] sm:$0xff]  ;;  %v231_v9 = vld [vmem:[%s631_s3 + $0x58] sm:$0xff]  ;;  %vm182_vm4 = vcmask 1041408   ;;  %s430_s18 = smov [#allocation3]  }
   0xd   :  { %v74_v43 = vadd.f32 %v73_v35, %v72_v38  ;;  %368 = vmatprep.subr.mxu1 %v428_v1  ;;  %v230_v10 = vld [vmem:[%s631_s3 + $0x50] sm:$0xff]  ;;  %v229_v11 = vld [vmem:[%s631_s3 + $0x48] sm:$0xff]  ;;  %v228_v12 = vld [vmem:[%s631_s3 + $0x40] sm:$0xff]  ;;  %s320_s19 = sshll.u32 %s430_s18, 4  ;;  %s321_s19 = int_to_ptr.vmem [resolvable:$true] %s320_s19 }
   0xe   :  { %v57_v44 = vadd.f32 %v56_v37, %v55_v39  ;;  %369 = vmatpush3.msra.mxu1 %v234_v6  ;;  %v227_v13 = vld [vmem:[%s631_s3 + $0x38] sm:$0xff]  ;;  %v226_v14 = vld [vmem:[%s631_s3 + $0x30] sm:$0xff]  ;;  %v225_v15 = vld [vmem:[%s631_s3 + $0x28] sm:$0xff]  ;;  %s406_s20 = scalar_lea.vmem %s321_s19, 32  ;;  %p411_p1 = scmp.lt.s32.totalorder %s321_s19, %s321_s19 }
   0xf   :  { %v76_v46 = vadd.f32 %v75_v40, %v74_v43  ;;  %370 = vmatprep.subr.mxu1 %v428_v1  ;;  %v224_v16 = vld [vmem:[%s631_s3 + $0x20] sm:$0xff]  ;;  %v223_v17 = vld [vmem:[%s631_s3 + $0x18] sm:$0xff]  ;;  %v222_v18 = vld [vmem:[%s631_s3 + $0x10] sm:$0xff]  ;;  %p407_p0 = scmp.ne.s32.totalorder %s321_s19, %s406_s20  ;;  %p412_p2 = scmp.lt.s32.totalorder %s406_s20, %s406_s20 }
  0x10   :  { %v59_v47 = vadd.f32 %v58_v42, %v57_v44  ;;  %371 = vmatpush3.msra.mxu1 %v233_v7  ;;  %v221_v19 = vld [vmem:[%s631_s3 + $0x8] sm:$0xff]  ;;  %v220_v20 = vld [vmem:[%s631_s3] sm:$0xff] }
  0x11   :  { %v78_v49 = vadd.f32 %v77_v45, %v76_v46  ;;  %372 = vmatprep.subr.mxu1 %v428_v1  ;;  %v328_v21 = vld [vmem:[%s630_s2] ss:$0 sm:$0xff]  ;;  %v330_v44 = vld [vmem:[%s630_s2 + $0x1] ss:$0 sm:$0xff]  ;;  %v331_v46 = vld [vmem:[%s630_s2 + $0x2] ss:$0 sm:$0xff]  ;;  %p413_p3 = por %p412_p2, %p411_p1 }
  0x12   :  { %v60_v50 = vrot.slane %v59_v47, 4  ;;  %373 = vmatpush3.msra.mxu1 %v232_v8 }
  0x13   :  { %v80_v51 = vadd.f32 %v79_v48, %v78_v49  ;;  %374 = vmatprep.subr.mxu1 %v428_v1  ;;  %p414_p4 = pnand %p413_p3, %p407_p0 }
  0x14   :  { %v61_v52 = vadd.f32 %v60_v50, %v59_v47  ;;  %375 = vmatpush3.msra.mxu1 %v231_v9 }
  0x15   :  { %v81_v53 = vrot.slane %v80_v51, 4  ;;  %376 = vmatprep.subr.mxu1 %v428_v1 }
  0x16   :  { %v62_v54 = vrot.slane %v61_v52, 2  ;;  %377 = vmatpush3.msra.mxu1 %v230_v10 }
  0x17   :  { %v82_v55 = vadd.f32 %v81_v53, %v80_v51  ;;  %378 = vmatprep.subr.mxu1 %v428_v1  ;;  %v332_v51 = vld [vmem:[%s632_s4] ss:$0 sm:$0xff] }
  0x18   :  { %v63_v56 = vadd.f32 %v62_v54, %v61_v52  ;;  %379 = vmatpush3.msra.mxu1 %v229_v11 }
  0x19   :  { %v83_v57 = vrot.slane %v82_v55, 2  ;;  %380 = vmatprep.subr.mxu1 %v428_v1 }
  0x1a   :  { %v64_v58 = vrot.slane %v63_v56, 1  ;;  %381 = vmatpush3.msra.mxu1 %v228_v12 }
  0x1b   :  { %v84_v59 = vadd.f32 %v83_v57, %v82_v55  ;;  %382 = vmatprep.subr.mxu1 %v428_v1 }
  0x1c   :  { %v65_v60 = vadd.f32 %v64_v58, %v63_v56  ;;  %383 = vmatpush3.msra.mxu1 %v227_v13 }
  0x1d   :  { %v85_v61 = vrot.slane %v84_v59, 1  ;;  %384 = vmatprep.subr.mxu1 %v428_v1 }
  0x1e   :  { %385 = vmatpush3.msra.mxu1 %v226_v14 }
  0x1f   :  { %v86_v63 = vadd.f32 %v85_v61, %v84_v59  ;;  %386 = vmatprep.subr.mxu1 %v428_v1 }
  0x20   :  { %387 = vmatpush3.msra.mxu1 %v225_v15 }
  0x21   :  { %v90_v0 = vsel %vm89_vm3, %v86_v63, %v65_v60  ;;  %388 = vmatprep.subr.mxu1 %v428_v1 }
  0x22   :  { %v92_v2 = vadd.f32 %v90_v0, %v27_v62  ;;  %389 = vmatpush3.msra.mxu1 %v224_v16 }
  0x23   :  { %390 = vmatprep.subr.mxu1 %v428_v1 }
  0x24   :  { %94 = vst.msk [vmem:[#allocation2] sm:$0x3] %vm25_vm0, %v92_v2  ;;  %391 = vmatpush3.msra.mxu1 %v223_v17 }
  0x25   :  { %392 = vmatprep.subr.mxu1 %v428_v1 }
  0x26   :  { %393 = vmatpush3.msra.mxu1 %v222_v18 }
  0x27   :  { %394 = vmatprep.subr.mxu1 %v428_v1 }
  0x28   :  { %395 = vmatpush3.msra.mxu1 %v221_v19 }
  0x29   :  { %396 = vmatprep.subr.mxu1 %v428_v1 }
  0x2a   :  { %397 = vmatpush3.msra.mxu1 %v220_v20 }
  0x2b   :  { %v98_v3 = vld [vmem:[#allocation2] sm:$0x3] }
  0x2c   :  { %v99_v4 = vmul.f32 0.015625, %v98_v3 }
  0x2e   :  { %364 = vmatmul.mubr.msk.f32.vlgmr.msra.gmra.mxu0 %vm44_vm2, %v99_v4 }
  0xee   :  { %v178_v22 = vpop.f32.mrf.mxu0 }
  0xef   :  { %v179_v23 = vadd.f32 %v328_v21, %v178_v22 }
  0xf0   :  { %v365_v24 = vpop.f32.mrf.mxu0 }
  0xf1   :  { %v183_v25 = vsel %vm182_vm4, %v179_v23, 0.0 }
  0xf2   :  { %v184_v26 = vrot.slane %v183_v25, 4 }
  0xf4   :  { %v185_v27 = vadd.f32 %v184_v26, %v183_v25 }
  0xf6   :  { %v186_v28 = vrot.slane %v185_v27, 2 }
  0xf8   :  { %v187_v29 = vadd.f32 %v186_v28, %v185_v27 }
  0xfa   :  { %v188_v30 = vrot.slane %v187_v29, 1 }
  0xfc   :  { %v189_v31 = vadd.f32 %v188_v30, %v187_v29 }
  0xfe   :  { %v191_v32 = vmul.f32 0.5, %v189_v31 }
 0x100   :  { %v192_v33 = vsub.f32 %v179_v23, %v191_v32 }
 0x102   :  { %v193_v34 = vmul.f32 %v192_v33, %v192_v33 }
 0x104   :  { %v194_v1 = vsel %vm182_vm4, %v193_v34, 0.0 }
 0x105   :  { %v195_v35 = vrot.slane %v194_v1, 4 }
 0x107   :  { %v196_v36 = vadd.f32 %v195_v35, %v194_v1 }
 0x109   :  { %v197_v37 = vrot.slane %v196_v36, 2 }
 0x10b   :  { %v198_v38 = vadd.f32 %v197_v37, %v196_v36 }
 0x10d   :  { %v199_v39 = vrot.slane %v198_v38, 1 }
 0x10f   :  { %v200_v40 = vadd.f32 %v199_v39, %v198_v38 }
 0x111   :  { %v201_v41 = vmul.f32 0.5, %v200_v40 }
 0x113   :  { %v202_v42 = vadd.f32 1e-05, %v201_v41 }
 0x115   :  { %404 = vrsqrt.f32 %v202_v42 }
 0x122   :  { %v405_v43 = vpop.eup %404 }
 0x123   :  { %v204_v45 = vmul.f32 %v405_v43, %v192_v33 }
 0x125   :  { %v210_v47 = vmul.f32 %v330_v44, %v204_v45 }
 0x127   :  { %v216_v48 = vadd.f32 %v331_v46, %v210_v47 }
 0x129   :  { %vm217_vm5 = vcmp.gt.f32.partialorder %v216_v48, 0.0  ;;  %v218_v49 = vmul.f32 0.2, %v216_v48 }
 0x12b   :  { %v219_v50 = vsel %vm217_vm5, %v216_v48, %v218_v49 }
 0x12c   :  { %399 = vmatmul.mubr.f32.vlgmr.msra.gmra.mxu1 %v219_v50 }
 0x1ec   :  { %v309_v52 = vpop.f32.mrf.mxu1 }
 0x1ed   :  { %v310_v53 = vadd.f32 %v332_v51, %v309_v52 }
 0x1ee   :  { %v400_v54 = vpop.f32.mrf.mxu1 }
 0x1ef   :  { %313 = vst [vmem:[#allocation3] sm:$0x3] %v310_v53 }
 0x1f0   :  { %417 = shalt.err (!%p414_p4)
}
 0x1f1   :  { %323 = dma.vmem_to_hbm [thread:$0]  %s321_s19, 32, %s633_s5, [#allocation4]  }
 0x1f2   :  { %426 = dma.done.wait [#allocation4], 32  }
 0x1f3   :  { %427 = vsyncadd [#allocation4], 4294967264 }
 0x1f4   :  { %327 = vsyncpa [#allocation4], 1 }

</bundles_post_ra>
